<compile_context>
chip_gen: v7x
topology: tpu7x:2x2x1
jax: 0.10.0
libtpu: 0.0.40
codegen_flags: <defaults>
</compile_context>

<pallas_src>
import functools

import jax
import jax.numpy as jnp
from jax.experimental import pallas as pl
from jax.experimental.pallas import tpu as pltpu

_EPS = 1e-5
_VMEM_WORKSET_BUDGET = 28 * 1024 * 1024   # target per-step working set
_VMEM_LIMIT_BYTES = 48 * 1024 * 1024      # explicit scoped-VMEM limit (all gens)


def _choose_tile_hw(hw, f_g, f_l, f_int, stream_itemsize):
    """Largest lane tile (multiple of 128, or full HW) within the VMEM budget."""
    per_col = (2 * (f_g + 2 * f_l + 2) * max(int(stream_itemsize), 2)  # streamed, x2 buf
               + 3 * f_int * 4)                                        # f32 intermediates
    cap = (min(65536, _VMEM_WORKSET_BUDGET // per_col) // 128) * 128
    cap = max(128, cap)
    return hw if hw <= cap else cap


# ---------------------------------------------------------------------------
# Pass 1: batch statistics (sum, sum of squares) of hg = Wg@g and hx = Wx@x,
# accumulated per batch index n (summed over n in the wrapper).  Columns past
# the true H*W extent (partial last tile) are masked out of the sums.
# ---------------------------------------------------------------------------
def _branch_stats_kernel(g_ref, x_ref, wg_ref, wx_ref,
                         shg_ref, sshg_ref, shx_ref, sshx_ref,
                         *, hw_total, tile_hw):
    m = pl.program_id(1)

    @pl.when(m == 0)
    def _init():
        shg_ref[...] = jnp.zeros_like(shg_ref)
        sshg_ref[...] = jnp.zeros_like(sshg_ref)
        shx_ref[...] = jnp.zeros_like(shx_ref)
        sshx_ref[...] = jnp.zeros_like(sshx_ref)

    g = g_ref[0].astype(jnp.float32)                       # (F_g, tile_hw)
    x = x_ref[0].astype(jnp.float32)                       # (F_l, tile_hw)
    hg = jnp.dot(wg_ref[...], g, preferred_element_type=jnp.float32)
    hx = jnp.dot(wx_ref[...], x, preferred_element_type=jnp.float32)

    col = m * tile_hw + jax.lax.broadcasted_iota(jnp.int32, hg.shape, 1)
    mask = col < hw_total
    hg = jnp.where(mask, hg, 0.0)
    hx = jnp.where(mask, hx, 0.0)

    shg_ref[...] += jnp.sum(hg, axis=1, keepdims=True)[None]
    sshg_ref[...] += jnp.sum(hg * hg, axis=1, keepdims=True)[None]
    shx_ref[...] += jnp.sum(hx, axis=1, keepdims=True)[None]
    sshx_ref[...] += jnp.sum(hx * hx, axis=1, keepdims=True)[None]


# ---------------------------------------------------------------------------
# Pass 2: s = relu(BN(Wg@g) + BN(Wx@x)) with BN folded into the weights,
# psi pre-activation p = sum_c(wpsi_c * s_c) (VPU multiply + sublane reduce,
# lane-dense (1, tile_hw)), written out; its BN statistics accumulated per n
# with padded columns masked out.
# ---------------------------------------------------------------------------
def _p_stats_kernel(g_ref, x_ref, wgf_ref, wxf_ref, shift_ref, wpsi_ref,
                    p_ref, sp_ref, ssp_ref, *, hw_total, tile_hw):
    m = pl.program_id(1)

    @pl.when(m == 0)
    def _init():
        sp_ref[...] = jnp.zeros_like(sp_ref)
        ssp_ref[...] = jnp.zeros_like(ssp_ref)

    g = g_ref[0].astype(jnp.float32)
    x = x_ref[0].astype(jnp.float32)
    s = jnp.dot(wgf_ref[...], g, preferred_element_type=jnp.float32)
    s = s + jnp.dot(wxf_ref[...], x, preferred_element_type=jnp.float32)
    s = jnp.maximum(s + shift_ref[...], 0.0)               # fused BN + ReLU

    p = jnp.sum(s * wpsi_ref[...], axis=0, keepdims=True)  # (1, tile_hw)
    p_ref[...] = p[None].astype(p_ref.dtype)

    col = m * tile_hw + jax.lax.broadcasted_iota(jnp.int32, p.shape, 1)
    pm = jnp.where(col < hw_total, p, 0.0)
    sp_ref[...] += jnp.sum(pm, axis=1, keepdims=True)[None]
    ssp_ref[...] += jnp.sum(pm * pm, axis=1, keepdims=True)[None]


# ---------------------------------------------------------------------------
# Pass 3: out = x * sigmoid(p * scale + shift).  Pure elementwise, fully
# parallel grid (megacore-friendly), f32 compute, output in x's dtype.
# ---------------------------------------------------------------------------
def _apply_kernel(x_ref, p_ref, scale_ref, shift_ref, out_ref):
    p = p_ref[0].astype(jnp.float32) * scale_ref[...] + shift_ref[...]
    gate = 1.0 / (1.0 + jnp.exp(-p))                       # exp -> EUP
    x = x_ref[0].astype(jnp.float32)
    out_ref[...] = (x * gate)[None].astype(out_ref.dtype)


def skip_attention(g, x, params, *, tile_hw=None):
    """g: (N, F_g, H, W), x: (N, F_l, H, W)  ->  (N, F_l, H, W) (x's dtype)."""
    N, F_g, H, W = g.shape
    _, F_l, _, _ = x.shape
    F_int = params["wg"].shape[0]
    HW = H * W
    M = N * HW

    # Natural NCHW layout; (N, C, H*W) is a free reshape (H*W lane-dense).
    g3 = g.reshape(N, F_g, HW)
    x3 = x.reshape(N, F_l, HW)

    if tile_hw is None:
        tile_hw = _choose_tile_hw(HW, F_g, F_l, F_int, g.dtype.itemsize)
    if tile_hw >= HW:
        tile_hw = HW
    else:
        tile_hw = max(128, (int(tile_hw) // 128) * 128)
    nm = pl.cdiv(HW, tile_hw)

    wg = params["wg"].astype(jnp.float32)                  # (F_int, F_g)
    wx = params["wx"].astype(jnp.float32)                  # (F_int, F_l)
    wpsi = params["wpsi"].astype(jnp.float32).reshape(F_int, 1)
    # Conv biases (bg, bx, bpsi) are exactly cancelled by the BN mean
    # subtraction, so they are dropped from the kernel path entirely.

    stream = lambda c: pl.BlockSpec((1, c, tile_hw), lambda n, m: (n, 0, m))
    rep = lambda shape: pl.BlockSpec(shape, lambda n, m: (0,) * len(shape))
    acc = lambda c: pl.BlockSpec((1, c, 1), lambda n, m: (n, 0, 0))

    stats_params = pltpu.CompilerParams(
        dimension_semantics=("parallel", "arbitrary"),
        vmem_limit_bytes=_VMEM_LIMIT_BYTES)
    par_params = pltpu.CompilerParams(
        dimension_semantics=("parallel", "parallel"),
        vmem_limit_bytes=_VMEM_LIMIT_BYTES)

    # ---- pass 1: branch batch statistics (per-n partial sums) -----------
    stat = jax.ShapeDtypeStruct((N, F_int, 1), jnp.float32)
    sum_hg, ss_hg, sum_hx, ss_hx = pl.pallas_call(
        functools.partial(_branch_stats_kernel, hw_total=HW, tile_hw=tile_hw),
        grid=(N, nm),
        in_specs=[stream(F_g), stream(F_l),
                  rep((F_int, F_g)), rep((F_int, F_l))],
        out_specs=[acc(F_int)] * 4,
        out_shape=[stat] * 4,
        compiler_params=stats_params,
    )(g3, x3, wg, wx)

    # Fold BatchNorm (training-mode biased stats, gamma=1, beta=0) into the
    # 1x1-conv weights: bn(W@v) = (W*inv) @ v - mu*inv.
    sum_hg, ss_hg = jnp.sum(sum_hg, axis=0), jnp.sum(ss_hg, axis=0)
    sum_hx, ss_hx = jnp.sum(sum_hx, axis=0), jnp.sum(ss_hx, axis=0)
    mu_hg = sum_hg / M
    inv_g = jax.lax.rsqrt(ss_hg / M - mu_hg * mu_hg + _EPS)
    mu_hx = sum_hx / M
    inv_x = jax.lax.rsqrt(ss_hx / M - mu_hx * mu_hx + _EPS)
    wg_fold = wg * inv_g                                   # (F_int, F_g)
    wx_fold = wx * inv_x                                   # (F_int, F_l)
    shift = -(mu_hg * inv_g + mu_hx * inv_x)               # (F_int, 1)

    # ---- pass 2: psi pre-activation + its batch statistics --------------
    p_raw, sum_p, ss_p = pl.pallas_call(
        functools.partial(_p_stats_kernel, hw_total=HW, tile_hw=tile_hw),
        grid=(N, nm),
        in_specs=[stream(F_g), stream(F_l),
                  rep((F_int, F_g)), rep((F_int, F_l)),
                  rep((F_int, 1)), rep((F_int, 1))],
        out_specs=[stream(1), acc(1), acc(1)],
        out_shape=[jax.ShapeDtypeStruct((N, 1, HW), jnp.float32),
                   jax.ShapeDtypeStruct((N, 1, 1), jnp.float32),
                   jax.ShapeDtypeStruct((N, 1, 1), jnp.float32)],
        compiler_params=stats_params,
    )(g3, x3, wg_fold, wx_fold, shift, wpsi)

    mu_p = jnp.sum(sum_p, axis=0) / M                      # (1, 1)
    inv_p = jax.lax.rsqrt(jnp.sum(ss_p, axis=0) / M - mu_p * mu_p + _EPS)
    p_scale = inv_p                                        # (1, 1)
    p_shift = -mu_p * inv_p                                # (1, 1)

    # ---- pass 3: normalize psi, sigmoid, gate x --------------------------
    out3 = pl.pallas_call(
        _apply_kernel,
        grid=(N, nm),
        in_specs=[stream(F_l), stream(1), rep((1, 1)), rep((1, 1))],
        out_specs=stream(F_l),
        out_shape=jax.ShapeDtypeStruct((N, F_l, HW), x.dtype),
        compiler_params=par_params,
    )(x3, p_raw, p_scale, p_shift)

    return out3.reshape(N, F_l, H, W)


# ---------------------------------------------------------------------------
# Pure-JAX reference (faithful to the PyTorch module: conv biases included,
# BatchNorm2d in training mode with default affine params).
# ---------------------------------------------------------------------------
def _reference(g, x, params):
    def conv1x1(w, b, v):
        return jnp.einsum("oi,nihw->nohw", w, v) + b[None, :, None, None]

    def bn(h):
        mu = jnp.mean(h, axis=(0, 2, 3), keepdims=True)
        var = jnp.mean((h - mu) ** 2, axis=(0, 2, 3), keepdims=True)
        return (h - mu) * jax.lax.rsqrt(var + _EPS)

    hg = bn(conv1x1(params["wg"], params["bg"], g))
    hx = bn(conv1x1(params["wx"], params["bx"], x))
    s = jnp.maximum(hg + hx, 0.0)
    p = jax.nn.sigmoid(bn(conv1x1(params["wpsi"], params["bpsi"], s)))
    return x * p


def init_params(key, F_g, F_l, F_int):
    ks = jax.random.split(key, 6)
    # 1x1 conv weights in PyTorch (C_out, C_in) layout.
    return {
        "wg": jax.random.normal(ks[0], (F_int, F_g), jnp.float32) * 0.3,
        "bg": jax.random.normal(ks[1], (F_int,), jnp.float32) * 0.1,
        "wx": jax.random.normal(ks[2], (F_int, F_l), jnp.float32) * 0.3,
        "bx": jax.random.normal(ks[3], (F_int,), jnp.float32) * 0.1,
        "wpsi": jax.random.normal(ks[4], (1, F_int), jnp.float32) * 0.3,
        "bpsi": jax.random.normal(ks[5], (1,), jnp.float32) * 0.1,
    }


if __name__ == "__main__":
    key = jax.random.PRNGKey(0)
    k_g, k_x, k_p = jax.random.split(key, 3)

    N, F_g, F_l, F_int, H, W = 2, 8, 4, 16, 16, 16
    g = jax.random.normal(k_g, (N, F_g, H, W), jnp.float32)
    x = jax.random.normal(k_x, (N, F_l, H, W), jnp.float32)
    params = init_params(k_p, F_g, F_l, F_int)
    ref = _reference(g, x, params)

    # Default (auto tile_hw -> single full-HW tile per image here).
    out = jax.block_until_ready(skip_attention(g, x, params))
    assert out.shape == (N, F_l, H, W)
    assert jnp.allclose(out, ref, atol=1e-4, rtol=1e-4), "mismatch (default)"

    # Multi-tile path (HW = 256, two 128-lane tiles, exact).
    out_t = jax.block_until_ready(skip_attention(g, x, params, tile_hw=128))
    assert jnp.allclose(out_t, ref, atol=1e-4, rtol=1e-4), "mismatch (tiled)"

    # Partial last tile (HW = 144, two 128-lane tiles, masked stats).
    g2 = jax.random.normal(jax.random.PRNGKey(1), (N, F_g, 12, 12), jnp.float32)
    x2 = jax.random.normal(jax.random.PRNGKey(2), (N, F_l, 12, 12), jnp.float32)
    out2 = jax.block_until_ready(skip_attention(g2, x2, params, tile_hw=128))
    ref2 = _reference(g2, x2, params)
    assert jnp.allclose(out2, ref2, atol=1e-4, rtol=1e-4), "mismatch (partial)"

    # bf16 HBM streaming (f32 compute/stats inside the kernels).
    out_b = jax.block_until_ready(
        skip_attention(g.astype(jnp.bfloat16), x.astype(jnp.bfloat16), params))
    assert out_b.dtype == jnp.bfloat16
    assert jnp.allclose(out_b.astype(jnp.float32), ref, atol=1e-1, rtol=1e-1), \
        "mismatch (bf16 streaming)"

    print("KERNEL_OK")
</pallas_src>

<mosaic_0001>
module attributes {stable_mosaic.version = 11 : i64} {
  func.func @_branch_stats_kernel(%arg0: i32, %arg1: i32, %arg2: memref<1x8x256xf32, #tpu.memory_space<vmem>>, %arg3: memref<1x4x256xf32, #tpu.memory_space<vmem>>, %arg4: memref<16x8xf32, #tpu.memory_space<vmem>>, %arg5: memref<16x4xf32, #tpu.memory_space<vmem>>, %arg6: memref<1x16x1xf32, #tpu.memory_space<vmem>>, %arg7: memref<1x16x1xf32, #tpu.memory_space<vmem>>, %arg8: memref<1x16x1xf32, #tpu.memory_space<vmem>>, %arg9: memref<1x16x1xf32, #tpu.memory_space<vmem>>) attributes {dimension_semantics = [#tpu.dimension_semantics<parallel>, #tpu.dimension_semantics<arbitrary>], iteration_bounds = array<i64: 2, 1>, scalar_prefetch = 0 : i64, scratch_operands = 0 : i64, tpu.core_type = #tpu.core_type<tc>, window_params = [{transform_indices = @transform_0, window_bounds = array<i64: 1, 8, 256>}, {transform_indices = @transform_1, window_bounds = array<i64: 1, 4, 256>}, {pipeline_mode = #tpu.pipeline_mode<synchronous>, transform_indices = @transform_2, window_bounds = array<i64: 16, 8>}, {pipeline_mode = #tpu.pipeline_mode<synchronous>, transform_indices = @transform_3, window_bounds = array<i64: 16, 4>}, {transform_indices = @transform_4, window_bounds = array<i64: 1, 16, 1>}, {transform_indices = @transform_5, window_bounds = array<i64: 1, 16, 1>}, {transform_indices = @transform_6, window_bounds = array<i64: 1, 16, 1>}, {transform_indices = @transform_7, window_bounds = array<i64: 1, 16, 1>}]} {
    %c0_i32 = arith.constant 0 : i32
    %0 = arith.cmpi eq, %arg1, %c0_i32 : i32
    %1 = arith.extui %0 : i1 to i32
    %c0_i32_0 = arith.constant 0 : i32
    %2 = arith.cmpi ne, %1, %c0_i32_0 : i32
    scf.if %2 {
      %cst_42 = arith.constant 0.000000e+00 : f32
      %47 = vector.broadcast %cst_42 : f32 to vector<1x16x1xf32>
      %c0_43 = arith.constant 0 : index
      %c0_44 = arith.constant 0 : index
      %c0_45 = arith.constant 0 : index
      %48 = vector.load %arg6[%c0_43, %c0_44, %c0_45] : memref<1x16x1xf32, #tpu.memory_space<vmem>>, vector<1x16x1xf32>
      tpu.vector_store %arg6[%c0_43, %c0_44, %c0_45], %47 {strides = array<i32>} : memref<1x16x1xf32, #tpu.memory_space<vmem>>, vector<1x16x1xf32>,
      %cst_46 = arith.constant 0.000000e+00 : f32
      %49 = vector.broadcast %cst_46 : f32 to vector<1x16x1xf32>
      %c0_47 = arith.constant 0 : index
      %c0_48 = arith.constant 0 : index
      %c0_49 = arith.constant 0 : index
      %50 = vector.load %arg7[%c0_47, %c0_48, %c0_49] : memref<1x16x1xf32, #tpu.memory_space<vmem>>, vector<1x16x1xf32>
      tpu.vector_store %arg7[%c0_47, %c0_48, %c0_49], %49 {strides = array<i32>} : memref<1x16x1xf32, #tpu.memory_space<vmem>>, vector<1x16x1xf32>,
      %cst_50 = arith.constant 0.000000e+00 : f32
      %51 = vector.broadcast %cst_50 : f32 to vector<1x16x1xf32>
      %c0_51 = arith.constant 0 : index
      %c0_52 = arith.constant 0 : index
      %c0_53 = arith.constant 0 : index
      %52 = vector.load %arg8[%c0_51, %c0_52, %c0_53] : memref<1x16x1xf32, #tpu.memory_space<vmem>>, vector<1x16x1xf32>
      tpu.vector_store %arg8[%c0_51, %c0_52, %c0_53], %51 {strides = array<i32>} : memref<1x16x1xf32, #tpu.memory_space<vmem>>, vector<1x16x1xf32>,
      %cst_54 = arith.constant 0.000000e+00 : f32
      %53 = vector.broadcast %cst_54 : f32 to vector<1x16x1xf32>
      %c0_55 = arith.constant 0 : index
      %c0_56 = arith.constant 0 : index
      %c0_57 = arith.constant 0 : index
      %54 = vector.load %arg9[%c0_55, %c0_56, %c0_57] : memref<1x16x1xf32, #tpu.memory_space<vmem>>, vector<1x16x1xf32>
      tpu.vector_store %arg9[%c0_55, %c0_56, %c0_57], %53 {strides = array<i32>} : memref<1x16x1xf32, #tpu.memory_space<vmem>>, vector<1x16x1xf32>,
    } else {
    }
    %c0 = arith.constant 0 : index
    %c0_1 = arith.constant 0 : index
    %c0_2 = arith.constant 0 : index
    %3 = vector.load %arg2[%c0, %c0_1, %c0_2] : memref<1x8x256xf32, #tpu.memory_space<vmem>>, vector<1x8x256xf32>
    %4 = vector.shape_cast %3 : vector<1x8x256xf32> to vector<8x256xf32>
    %c0_3 = arith.constant 0 : index
    %c0_4 = arith.constant 0 : index
    %c0_5 = arith.constant 0 : index
    %5 = vector.load %arg3[%c0_3, %c0_4, %c0_5] : memref<1x4x256xf32, #tpu.memory_space<vmem>>, vector<1x4x256xf32>
    %6 = vector.shape_cast %5 : vector<1x4x256xf32> to vector<4x256xf32>
    %c0_6 = arith.constant 0 : index
    %c0_7 = arith.constant 0 : index
    %7 = vector.load %arg4[%c0_6, %c0_7] : memref<16x8xf32, #tpu.memory_space<vmem>>, vector<16x8xf32>
    %cst = arith.constant dense<0.000000e+00> : vector<16x256xf32>
    %8 = tpu.matmul %7, %4, %cst {dimension_numbers = #tpu.dot_dimension_numbers<[1], [0], [0], [1], [0, 0, 1, 1], [], []>} : vector<16x8xf32>, vector<8x256xf32>, vector<16x256xf32> -> vector<16x256xf32>
    %c0_8 = arith.constant 0 : index
    %c0_9 = arith.constant 0 : index
    %9 = vector.load %arg5[%c0_8, %c0_9] : memref<16x4xf32, #tpu.memory_space<vmem>>, vector<16x4xf32>
    %cst_10 = arith.constant dense<0.000000e+00> : vector<16x256xf32>
    %10 = tpu.matmul %9, %6, %cst_10 {dimension_numbers = #tpu.dot_dimension_numbers<[1], [0], [0], [1], [0, 0, 1, 1], [], []>} : vector<16x4xf32>, vector<4x256xf32>, vector<16x256xf32> -> vector<16x256xf32>
    %c256_i32 = arith.constant 256 : i32
    %11 = arith.muli %arg1, %c256_i32 : i32
    %12 = tpu.iota {dimensions = array<i32: 1>} : vector<16x256xi32>
    %13 = vector.broadcast %11 : i32 to vector<16x256xi32>
    %14 = arith.addi %13, %12 : vector<16x256xi32>
    %c256_i32_11 = arith.constant 256 : i32
    %15 = vector.broadcast %c256_i32_11 : i32 to vector<16x256xi32>
    %16 = arith.cmpi slt, %14, %15 : vector<16x256xi32>
    %cst_12 = arith.constant 0.000000e+00 : f32
    %17 = vector.broadcast %cst_12 : f32 to vector<16x256xf32>
    %18 = arith.select %16, %8, %17 : vector<16x256xi1>, vector<16x256xf32>
    %cst_13 = arith.constant 0.000000e+00 : f32
    %19 = vector.broadcast %cst_13 : f32 to vector<16x256xf32>
    %20 = arith.select %16, %10, %19 : vector<16x256xi1>, vector<16x256xf32>
    %c0_14 = arith.constant 0 : index
    %c0_15 = arith.constant 0 : index
    %c0_16 = arith.constant 0 : index
    %21 = vector.load %arg6[%c0_14, %c0_15, %c0_16] : memref<1x16x1xf32, #tpu.memory_space<vmem>>, vector<1x16x1xf32>
    %cst_17 = arith.constant dense<0.000000e+00> : vector<16xf32>
    %22 = vector.multi_reduction <add>, %18, %cst_17 [1] : vector<16x256xf32> to vector<16xf32>
    %23 = vector.shape_cast %22 : vector<16xf32> to vector<16x1xf32>
    %24 = vector.shape_cast %23 : vector<16x1xf32> to vector<1x16x1xf32>
    %25 = arith.addf %21, %24 : vector<1x16x1xf32>
    %c0_18 = arith.constant 0 : index
    %c0_19 = arith.constant 0 : index
    %c0_20 = arith.constant 0 : index
    %26 = vector.load %arg6[%c0_18, %c0_19, %c0_20] : memref<1x16x1xf32, #tpu.memory_space<vmem>>, vector<1x16x1xf32>
    tpu.vector_store %arg6[%c0_18, %c0_19, %c0_20], %25 {strides = array<i32>} : memref<1x16x1xf32, #tpu.memory_space<vmem>>, vector<1x16x1xf32>,
    %c0_21 = arith.constant 0 : index
    %c0_22 = arith.constant 0 : index
    %c0_23 = arith.constant 0 : index
    %27 = vector.load %arg7[%c0_21, %c0_22, %c0_23] : memref<1x16x1xf32, #tpu.memory_space<vmem>>, vector<1x16x1xf32>
    %28 = arith.mulf %18, %18 : vector<16x256xf32>
    %cst_24 = arith.constant dense<0.000000e+00> : vector<16xf32>
    %29 = vector.multi_reduction <add>, %28, %cst_24 [1] : vector<16x256xf32> to vector<16xf32>
    %30 = vector.shape_cast %29 : vector<16xf32> to vector<16x1xf32>
    %31 = vector.shape_cast %30 : vector<16x1xf32> to vector<1x16x1xf32>
    %32 = arith.addf %27, %31 : vector<1x16x1xf32>
    %c0_25 = arith.constant 0 : index
    %c0_26 = arith.constant 0 : index
    %c0_27 = arith.constant 0 : index
    %33 = vector.load %arg7[%c0_25, %c0_26, %c0_27] : memref<1x16x1xf32, #tpu.memory_space<vmem>>, vector<1x16x1xf32>
    tpu.vector_store %arg7[%c0_25, %c0_26, %c0_27], %32 {strides = array<i32>} : memref<1x16x1xf32, #tpu.memory_space<vmem>>, vector<1x16x1xf32>,
    %c0_28 = arith.constant 0 : index
    %c0_29 = arith.constant 0 : index
    %c0_30 = arith.constant 0 : index
    %34 = vector.load %arg8[%c0_28, %c0_29, %c0_30] : memref<1x16x1xf32, #tpu.memory_space<vmem>>, vector<1x16x1xf32>
    %cst_31 = arith.constant dense<0.000000e+00> : vector<16xf32>
    %35 = vector.multi_reduction <add>, %20, %cst_31 [1] : vector<16x256xf32> to vector<16xf32>
    %36 = vector.shape_cast %35 : vector<16xf32> to vector<16x1xf32>
    %37 = vector.shape_cast %36 : vector<16x1xf32> to vector<1x16x1xf32>
    %38 = arith.addf %34, %37 : vector<1x16x1xf32>
    %c0_32 = arith.constant 0 : index
    %c0_33 = arith.constant 0 : index
    %c0_34 = arith.constant 0 : index
    %39 = vector.load %arg8[%c0_32, %c0_33, %c0_34] : memref<1x16x1xf32, #tpu.memory_space<vmem>>, vector<1x16x1xf32>
    tpu.vector_store %arg8[%c0_32, %c0_33, %c0_34], %38 {strides = array<i32>} : memref<1x16x1xf32, #tpu.memory_space<vmem>>, vector<1x16x1xf32>,
    %c0_35 = arith.constant 0 : index
    %c0_36 = arith.constant 0 : index
    %c0_37 = arith.constant 0 : index
    %40 = vector.load %arg9[%c0_35, %c0_36, %c0_37] : memref<1x16x1xf32, #tpu.memory_space<vmem>>, vector<1x16x1xf32>
    %41 = arith.mulf %20, %20 : vector<16x256xf32>
    %cst_38 = arith.constant dense<0.000000e+00> : vector<16xf32>
    %42 = vector.multi_reduction <add>, %41, %cst_38 [1] : vector<16x256xf32> to vector<16xf32>
    %43 = vector.shape_cast %42 : vector<16xf32> to vector<16x1xf32>
    %44 = vector.shape_cast %43 : vector<16x1xf32> to vector<1x16x1xf32>
    %45 = arith.addf %40, %44 : vector<1x16x1xf32>
    %c0_39 = arith.constant 0 : index
    %c0_40 = arith.constant 0 : index
    %c0_41 = arith.constant 0 : index
    %46 = vector.load %arg9[%c0_39, %c0_40, %c0_41] : memref<1x16x1xf32, #tpu.memory_space<vmem>>, vector<1x16x1xf32>
    tpu.vector_store %arg9[%c0_39, %c0_40, %c0_41], %45 {strides = array<i32>} : memref<1x16x1xf32, #tpu.memory_space<vmem>>, vector<1x16x1xf32>,
    return
  }
  func.func @transform_0(%arg0: i32, %arg1: i32) -> (i32, i32, i32) {
    %c0_i32 = arith.constant 0 : i32
    %c0_i32_0 = arith.constant 0 : i32
    return %arg0, %c0_i32, %arg1 : i32, i32, i32
  }
  func.func @transform_1(%arg0: i32, %arg1: i32) -> (i32, i32, i32) {
    %c0_i32 = arith.constant 0 : i32
    %c0_i32_0 = arith.constant 0 : i32
    return %arg0, %c0_i32, %arg1 : i32, i32, i32
  }
  func.func @transform_2(%arg0: i32, %arg1: i32) -> (i32, i32) {
    %c0_i32 = arith.constant 0 : i32
    %c0_i32_0 = arith.constant 0 : i32
    %c0_i32_1 = arith.constant 0 : i32
    return %c0_i32, %c0_i32_0 : i32, i32
  }
  func.func @transform_3(%arg0: i32, %arg1: i32) -> (i32, i32) {
    %c0_i32 = arith.constant 0 : i32
    %c0_i32_0 = arith.constant 0 : i32
    %c0_i32_1 = arith.constant 0 : i32
    return %c0_i32, %c0_i32_0 : i32, i32
  }
  func.func @transform_4(%arg0: i32, %arg1: i32) -> (i32, i32, i32) {
    %c0_i32 = arith.constant 0 : i32
    %c0_i32_0 = arith.constant 0 : i32
    %c0_i32_1 = arith.constant 0 : i32
    return %arg0, %c0_i32, %c0_i32_0 : i32, i32, i32
  }
  func.func @transform_5(%arg0: i32, %arg1: i32) -> (i32, i32, i32) {
    %c0_i32 = arith.constant 0 : i32
    %c0_i32_0 = arith.constant 0 : i32
    %c0_i32_1 = arith.constant 0 : i32
    return %arg0, %c0_i32, %c0_i32_0 : i32, i32, i32
  }
  func.func @transform_6(%arg0: i32, %arg1: i32) -> (i32, i32, i32) {
    %c0_i32 = arith.constant 0 : i32
    %c0_i32_0 = arith.constant 0 : i32
    %c0_i32_1 = arith.constant 0 : i32
    return %arg0, %c0_i32, %c0_i32_0 : i32, i32, i32
  }
  func.func @transform_7(%arg0: i32, %arg1: i32) -> (i32, i32, i32) {
    %c0_i32 = arith.constant 0 : i32
    %c0_i32_0 = arith.constant 0 : i32
    %c0_i32_1 = arith.constant 0 : i32
    return %arg0, %c0_i32, %c0_i32_0 : i32, i32, i32
  }
}

</mosaic_0001>

<bundles_post_ra>
// kernel: tpu_custom_call.1
= control target key start
LH: loop header
LB: loop body
LE: loop exit
PB: predicated region body
PF: predicated region fallthrough
CT: control target
= control target key end

     0   :  { %13 = vsyncpa [#allocation3], 0  ;;  %s1281_s0 = inlined_call_operand.vmem [shape: f32[2,8,256], index: 0, kind: input, shape index: {}]   ;;  %s1282_s1 = inlined_call_operand.hbm [shape: f32[2,4,256], index: 1, kind: input, shape index: {}]   ;;  %s1283_s2 = inlined_call_operand.vmem [shape: f32[16,8], index: 2, kind: input, shape index: {}]   ;;  %s1284_s3 = inlined_call_operand.vmem [shape: f32[16,4], index: 3, kind: input, shape index: {}]   ;;  %s1285_s4 = inlined_call_operand.vmem [shape: f32[2,16,1], index: 4, kind: output, shape index: {0}]   ;;  %s1286_s5 = inlined_call_operand.vmem [shape: f32[2,16,1], index: 5, kind: output, shape index: {1}]   ;;  %s1287_s6 = inlined_call_operand.vmem [shape: f32[2,16,1], index: 6, kind: output, shape index: {2}]   ;;  %s1288_s7 = inlined_call_operand.vmem [shape: f32[2,16,1], index: 7, kind: output, shape index: {3}]  }
   0x1   :  { %15 = vsyncpa [#allocation3 + $0x1], 0  ;;  %s1065_s24 = smov 0   ;;  %s1067_s25 = smov 0  }
   0x2   :  { %s1069_s26 = smov 0   ;;  %s1071_s27 = smov 0  }
   0x3   :  { %s1073_s28 = smov 0   ;;  %s1075_s29 = smov 0  }
   0x4 LB: > { %s851_s30 = sadd.s32 4294967295, %s1021_s29   ;;  %s33_s8 = sadd.s32 1, %s1017_s28  ;;  %s1021_s29 = sphi %s1075_s29, %s21_s29   ;;  %s1017_s28 = sphi %s1073_s28, %s1298_s28   ;;  %s1013_s27 = sphi %s1071_s27, %s1297_s27   ;;  %s1009_s26 = sphi %s1069_s26, %s1296_s26   ;;  %s1005_s25 = sphi %s1067_s25, %s1295_s25   ;;  %s1001_s24 = sphi %s1065_s24, %s1294_s24  }
   0x5   : > { %p35_p0 = scmp.ge.s32.totalorder %s33_s8, 2  ;;  %s70_s9 = sadd.s32 1, %s1009_s26 }
   0x6   : > { %p77_p1 = scmp.ne.s32.totalorder %s1009_s26, %s1005_s25  ;;  %p78_p2 = scmp.eq.s32.totalorder %s1021_s29, 0 }
   0x7   : > { %s1300_s8 = smov (%p35_p0, %s33_s8), 0  ;;  %p83_p4 = scmp.ne.s32.totalorder %s1005_s25, %s1001_s24 }
   0x8   : > { %p1101_p3 = por %p78_p2, %p77_p1  ;;  %s65_s11 = ssub.s32 %s1017_s28, %s1300_s8 }
   0x9   : > { %p84_p5 = scmp.eq.s32.totalorder %s851_s30, 0  ;;  %p68_p6 = scmp.eq.s32.totalorder %s65_s11, 0 }
   0xa   : > { %p890_p8 = scmp.lt.s32.totalorder %s1021_s29, 2  ;;  %s272_s14 = sand.u32 1, %s1009_s26  }
   0xb   : > { %p1108_p7 = por %p84_p5, %p83_p4  ;;  %s878_s15 = sshll.u32 %s1017_s28, 7 }
   0xc   : > { %s1114_s13 = scalar_select %p68_p6, %s1009_s26, %s70_s9  }
   0xd   : > { %s855_s16 = sshll.u32 %s272_s14, 3  ;;  %s1121_s19 = scalar_lea.hbm %s1282_s1, %s878_s15 }
   0xe   : > { %s276_s20 = scalar_lea.vmem [#allocation2], %s855_s16  ;;  %p1125_p9 = pnand %p890_p8, %p1101_p3 }
   0xf   : > { %s286_s21 = sshll.u32 %s276_s20, 4  ;;  %s273_s23 = scalar_lea.sflag [#allocation3], %s272_s14  ;;  %s1129_s21 = int_to_ptr.vmem [resolvable:$true] %s286_s21 }
  0x10   : > { %s941_s24 = scalar_lea.hbm %s1121_s19, 128  ;;  %p943_p13 = pneg %p1125_p9 }
  0x11   : > { %p942_p12 = scmp.ne.s32.totalorder %s1121_s19, %s941_s24  ;;  %s946_s10 = scalar_lea.hbm %s1282_s1, 256 }
  0x12   : > { %p947_p2 = scmp.lt.u32.totalorder %s1121_s19, %s1282_s1  ;;  %p948_p3 = scmp.lt.u32.totalorder %s946_s10, %s941_s24 }
  0x13   : > { %p944_p0 = pnand %p943_p13, %p942_p12  ;;  %p950_p5 = scmp.lt.u32.totalorder %s941_s24, %s1121_s19 }
  0x14   : > { %p949_p4 = por %p948_p3, %p947_p2 }
  0x15   : > { %p945_p1 = pneg %p944_p0 }
  0x16   : > { %p951_p6 = por %p950_p5, %p949_p4 }
  0x18   : > { %p952_p8 = pnand %p951_p6, %p945_p1 }
  0x1a   : > { %955 = shalt.err (!%p952_p8)
}
  0x1b   : > { %s956_s14 = scalar_lea.vmem %s1129_s21, 128  ;;  %s1023_s16 = smov [#allocation2]  }
  0x1c   : > { %p957_p12 = scmp.ne.s32.totalorder %s1129_s21, %s956_s14  ;;  %s961_s17 = sshll.u32 %s1023_s16, 4  ;;  %s962_s17 = int_to_ptr.vmem [resolvable:$false] %s961_s17 }
  0x1d   : > { %s963_s18 = scalar_lea.vmem %s962_s17, 256  ;;  %p964_p11 = scmp.lt.s32.totalorder %s1129_s21, %s962_s17 }
  0x1e   : > { %p959_p0 = pnand %p957_p12, %p943_p13  ;;  %p965_p2 = scmp.lt.s32.totalorder %s963_s18, %s956_s14 }
  0x20   : > { %p960_p10 = pneg %p959_p0  ;;  %p966_p3 = por %p965_p2, %p964_p11 }
  0x22   : > { %p967_p4 = pnand %p966_p3, %p960_p10 }
  0x24   : > { %970 = shalt.err (!%p967_p4)
}
  0x25   : > { %889 = dma.hbm_to_vmem [thread:$0]  (!%p1125_p9), %s1121_s19, 128, %s1129_s21, %s273_s23  }
  0x26   : > { %p1292_p1 = scmp.lt.s32.totalorder %s1021_s29, 3  ;;  %p1293_p5 = scmp.ge.s32.totalorder %s1021_s29, 1 }
  0x28   : > { %p292_p13 = pnand %p1293_p5, %p1292_p1 }
  0x29   : > { %s297_s20 = sand.u32 (!%p292_p13), 1, %s1005_s25  }
  0x2a   : > { %295 = sbr.rel (%p292_p13) target bundleno = 432 (0x1b0), region = 36  ;;  %s859_s24 = sshll.u32 (!%p292_p13), %s297_s20, 3 }
  0x2b   : > { %s298_s30 = scalar_lea.sflag (!%p292_p13), [#allocation3], %s297_s20  ;;  %s301_s9 = scalar_lea.vmem (!%p292_p13), [#allocation2], %s859_s24 }
  0x31   : > { %996 = dma.done.wait (%p1108_p7), %s298_s30, 128  }
  0x32   : > { %998 = vsyncadd (%p1108_p7), %s298_s30, 4294967168  ;;  %p357_p10 = scmp.lt.s32.totalorder %s1013_s27, 1  ;;  %v1024_v0 = vmov 0.0   ;;  %v403_v3 = vld [vmem:[%s1283_s2] sm:$0xff]  ;;  %vm405_vm0 = vcmask 64512   ;;  %vm500_vm1 = vcmask 1043456  }
  0x33   : > { %476 = vmatprep.mubr.f32.mxu0 %v1024_v0  ;;  %569 = vmatprep.mubr.f32.mxu1 %v1024_v0  ;;  %v402_v4 = vld [vmem:[%s301_s9] sm:$0xff]  ;;  %vm493_vm2 = vcmask 31744   ;;  %vm391_vm3 = vcmask 7168  }
  0x34   : > { %s1302_s27 = smov (!%p357_p10, %s1013_s27), 1  ;;  %v492_v5 = vcombine.high %v402_v4, %v402_v4  ;;  %v489_v6 = vld [vmem:[%s1284_s3] sm:$0xff]  ;;  %v404_v7 = vld [vmem:[%s1283_s2 + $0x8] sm:$0xff] }
  0x35   : > { %s1171_s19 = sshll.u32 %s1302_s27, 4  ;;  %v490_v8 = vld [vmem:[%s1284_s3 + $0x8] sm:$0xff] }
  0x36   : > { %s364_s23 = scalar_lea.vmem %s1281_s0, %s1171_s19  ;;  %872 = vmatprep.subr.msk.mxu1 %vm500_vm1, %v492_v5  ;;  %s1195_s24 = scalar_lea.vmem %s1285_s4, %s1171_s19 }
  0x37   : > { %v401_v1 = vld [vmem:[%s364_s23 + $0x8] sm:$0xff]  ;;  %v400_v2 = vld [vmem:[%s364_s23] sm:$0xff]  ;;  %873 = vmatpush1.msk.msra.mxu1 %vm500_vm1, %v402_v4  ;;  %392 = vst.msk [vmem:[%s1195_s24] sm:$0xff] %vm391_vm3, %v1024_v0  ;;  %393 = vst.msk [vmem:[%s1195_s24 + $0x8] sm:$0xff] %vm391_vm3, %v1024_v0  ;;  %s1207_s21 = scalar_lea.vmem %s1286_s5, %s1171_s19  ;;  %s1219_s12 = scalar_lea.vmem %s1287_s6, %s1171_s19 }
  0x38   : > { %412 = vmatprep.subr.mxu0 %v401_v1  ;;  %874 = vmatmul.mubr.msk.f32.vlgmr.msra.gmra.mrb[0].mxu1 %vm493_vm2, %v489_v6  ;;  %394 = vst.msk [vmem:[%s1207_s21] sm:$0xff] %vm391_vm3, %v1024_v0  ;;  %395 = vst.msk [vmem:[%s1207_s21 + $0x8] sm:$0xff] %vm391_vm3, %v1024_v0  ;;  %s1231_s11 = scalar_lea.vmem %s1288_s7, %s1171_s19 }
  0x39   : > { %413 = vmatpush1.msra.mxu0 %v400_v2  ;;  %575 = vmatprep.mubr.f32.mxu1 %v1024_v0  ;;  %396 = vst.msk [vmem:[%s1219_s12] sm:$0xff] %vm391_vm3, %v1024_v0  ;;  %397 = vst.msk [vmem:[%s1219_s12 + $0x8] sm:$0xff] %vm391_vm3, %v1024_v0 }
  0x3a   : > { %870 = vmatmul.mubr.msk.f32.vlgmr.msra.gmra.mrb[0].mxu0 %vm405_vm0, %v403_v3  ;;  %398 = vst.msk [vmem:[%s1231_s11] sm:$0xff] %vm391_vm3, %v1024_v0  ;;  %399 = vst.msk [vmem:[%s1231_s11 + $0x8] sm:$0xff] %vm391_vm3, %v1024_v0 }
  0x3b   : > { %482 = vmatprep.mubr.f32.mxu0 %v1024_v0 }
  0x3c   : > { %875 = vmatmul.mubr.msk.f32.gmra.mrb[2].mxu1 %vm493_vm2, %v490_v8 }
  0x3e   : > { %871 = vmatmul.mubr.msk.f32.gmra.mrb[2].mxu0 %vm405_vm0, %v404_v7  ;;  %v599_v33 = vld [vmem:[%s1195_s24] sm:$0xff]  ;;  %v600_v44 = vld [vmem:[%s1195_s24 + $0x8] sm:$0xff] }
  0x3f   : > { %v612_v35 = vld [vmem:[%s1207_s21] sm:$0xff]  ;;  %v613_v41 = vld [vmem:[%s1207_s21 + $0x8] sm:$0xff] }
  0x40   : > { %v628_v38 = vld [vmem:[%s1219_s12] sm:$0xff]  ;;  %v629_v47 = vld [vmem:[%s1219_s12 + $0x8] sm:$0xff] }
  0x41   : > { %v640_v50 = vld [vmem:[%s1231_s11] sm:$0xff]  ;;  %v641_v53 = vld [vmem:[%s1231_s11 + $0x8] sm:$0xff] }
 0x10b   : > { %v571_v14 = vpop.f32.mrb[0].mxu1 }
 0x10c   : > { %v642_v15 = vmul.f32 %v571_v14, %v571_v14  ;;  %v573_v17 = vpop.f32.mrb[1].mxu1 }
 0x10d   : > { %v478_v9 = vpop.f32.mrb[0].mxu0  ;;  %v643_v21 = vmul.f32 %v573_v17, %v573_v17  ;;  %v630_v22 = vadd.f32 %v573_v17, %v571_v14 }
 0x10e   : > { %v614_v10 = vmul.f32 %v478_v9, %v478_v9  ;;  %v480_v11 = vpop.f32.mrb[1].mxu0 }
 0x10f   : > { %v615_v12 = vmul.f32 %v480_v11, %v480_v11  ;;  %v601_v13 = vadd.f32 %v480_v11, %v478_v9  ;;  %v577_v25 = vpop.f32.mrb[2].mxu1  ;;  %v646_v26 = vadd.f32 %v643_v21, %v642_v15 }
 0x110   : > { %v644_v27 = vmul.f32 %v577_v25, %v577_v25  ;;  %v579_v28 = vpop.f32.mrb[3].mxu1 }
 0x111   : > { %602 = vadd.xlane.f32.xlu0 %v601_v13  ;;  %v484_v16 = vpop.f32.mrb[2].mxu0  ;;  %v618_v18 = vadd.f32 %v615_v12, %v614_v10  ;;  %v633_v30 = vadd.f32 %v579_v28, %v577_v25  ;;  %v645_v31 = vmul.f32 %v579_v28, %v579_v28 }
 0x112   : > { %v616_v19 = vmul.f32 %v484_v16, %v484_v16  ;;  %v486_v20 = vpop.f32.mrb[3].mxu0 }
 0x113   : > { %v604_v23 = vadd.f32 %v486_v20, %v484_v16  ;;  %v617_v24 = vmul.f32 %v486_v20, %v486_v20  ;;  %619 = vadd.xlane.f32.xlu1 %v618_v18  ;;  %v649_v32 = vadd.f32 %v645_v31, %v644_v27 }
 0x115   : > { %631 = vadd.xlane.f32.xlu0 %v630_v22  ;;  %v621_v29 = vadd.f32 %v617_v24, %v616_v19 }
 0x117   : > { %622 = vadd.xlane.f32.xlu1 %v621_v29 }
 0x119   : > { %605 = vadd.xlane.f32.xlu0 %v604_v23 }
 0x11b   : > { %634 = vadd.xlane.f32.xlu1 %v633_v30 }
 0x11d   : > { %647 = vadd.xlane.f32.xlu0 %v646_v26 }
 0x11f   : > { %650 = vadd.xlane.f32.xlu1 %v649_v32 }
 0x19e   : > { %v603_v34 = vpop.xlane.xlu0 %602 }
 0x19f   : > { %v607_v36 = vadd.f32 %v603_v34, %v599_v33 }
 0x1a0   : > { %v620_v37 = vpop.xlane.xlu1 %619 }
 0x1a1   : > { %610 = vst.msk [vmem:[%s1195_s24] sm:$0xff] %vm391_vm3, %v607_v36  ;;  %v624_v39 = vadd.f32 %v620_v37, %v612_v35 }
 0x1a2   : > { %v632_v40 = vpop.xlane.xlu0 %631 }
 0x1a3   : > { %626 = vst.msk [vmem:[%s1207_s21] sm:$0xff] %vm391_vm3, %v624_v39  ;;  %v636_v42 = vadd.f32 %v632_v40, %v628_v38 }
 0x1a4   : > { %v623_v43 = vpop.xlane.xlu1 %622 }
 0x1a5   : > { %638 = vst.msk [vmem:[%s1219_s12] sm:$0xff] %vm391_vm3, %v636_v42  ;;  %v625_v45 = vadd.f32 %v623_v43, %v613_v41 }
 0x1a6   : > { %v606_v46 = vpop.xlane.xlu0 %605 }
 0x1a7   : > { %627 = vst.msk [vmem:[%s1207_s21 + $0x8] sm:$0xff] %vm391_vm3, %v625_v45  ;;  %v608_v48 = vadd.f32 %v606_v46, %v600_v44 }
 0x1a8   : > { %v635_v49 = vpop.xlane.xlu1 %634 }
 0x1a9   : > { %611 = vst.msk [vmem:[%s1195_s24 + $0x8] sm:$0xff] %vm391_vm3, %v608_v48  ;;  %v637_v51 = vadd.f32 %v635_v49, %v629_v47 }
 0x1aa   : > { %v648_v52 = vpop.xlane.xlu0 %647 }
 0x1ab   : > { %639 = vst.msk [vmem:[%s1219_s12 + $0x8] sm:$0xff] %vm391_vm3, %v637_v51  ;;  %v652_v54 = vadd.f32 %v648_v52, %v640_v50 }
 0x1ac   : > { %v651_v55 = vpop.xlane.xlu1 %650 }
 0x1ad   : > { %654 = vst.msk [vmem:[%s1231_s11] sm:$0xff] %vm391_vm3, %v652_v54  ;;  %v653_v56 = vadd.f32 %v651_v55, %v641_v53 }
 0x1af   : > { %655 = vst.msk [vmem:[%s1231_s11 + $0x8] sm:$0xff] %vm391_vm3, %v653_v56 }
 0x1b0 PF: > { %s21_s29 = sadd.s32 1, %s1021_s29   ;;  %s1294_s24 = smov %s1005_s25 }
 0x1b1   : > { %p18_p7 = scmp.ge.s32.totalorder %s21_s29, 4   ;;  %s1295_s25 = smov %s1009_s26 }
 0x1b2   : > { %s1296_s26 = smov %s1114_s13  ;;  %s1297_s27 = smov %s1017_s28 }
 0x1b3   : > { %s1298_s28 = smov %s1300_s8  ;;  %20 = sbr.rel (!%p18_p7) target bundleno = 4 (0x4), region = 119 }
 0x1ba   :  { %725 = vsyncpa [#allocation3], 1 }
 0x1bb   :  { %727 = vsyncpa [#allocation3 + $0x1], 1 }

</bundles_post_ra>
